<compile_context>
chip_gen: v7x
topology: tpu7x:2x2x1
jax: 0.10.0
libtpu: 0.0.40
codegen_flags: <defaults>
</compile_context>

<pallas_src>
import jax
import jax.numpy as jnp
from jax.experimental import pallas as pl
from jax.experimental.pallas import tpu as pltpu


def _critic_kernel(st_ref, at_ref, wss_ref, wx_ref, waa_ref, q_ref):
    # st: (ds, TB), at: (da, TB) — features on sublanes, batch on lanes.
    # Weight blocks are VMEM-resident across the batch grid.
    s = st_ref[...]
    a = at_ref[...]
    # P_s = W_ss @ S + (W_sa + W_as^T) @ A   -> (ds, TB) on the MXU (batch on N/lanes)
    p_s = (jnp.dot(wss_ref[...], s, preferred_element_type=jnp.float32)
           + jnp.dot(wx_ref[...], a, preferred_element_type=jnp.float32))
    # P_a = W_aa @ A                          -> (da, TB)
    p_a = jnp.dot(waa_ref[...], a, preferred_element_type=jnp.float32)
    # q[b] = s^T W_ss s + s^T (W_sa + W_as^T) a + a^T W_aa a
    # Sublane reduction: result is already the lane-dense (1, TB) output block.
    q = (jnp.sum(s * p_s, axis=0, keepdims=True)
         + jnp.sum(a * p_a, axis=0, keepdims=True))
    q_ref[...] = q.astype(q_ref.dtype)


def critic_forward(state: jax.Array, action: jax.Array, weight: jax.Array,
                   *, block_b: int = 1024,
                   compute_dtype=jnp.float32) -> jax.Array:
    """state (B, ds), action (B, da), weight (1, (ds+da)^2) [PyTorch Linear, bias=False].

    Returns q of shape (B, 1), matching Critic.forward.
    compute_dtype=jnp.bfloat16 is an optional bandwidth saver for v5e (accum stays f32).
    """
    B, ds = state.shape
    da = action.shape[1]
    n = ds + da

    w = weight.reshape(n, n).astype(jnp.float32)
    # Quadratic form only sees the symmetric part of W: fold the two cross blocks.
    wss = w[:ds, :ds].astype(compute_dtype)                       # (ds, ds)
    wx = (w[:ds, ds:] + w[ds:, :ds].T).astype(compute_dtype)      # (ds, da)
    waa = w[ds:, ds:].astype(compute_dtype)                       # (da, da)

    # Feature-major streaming: batch on the lane axis (one small XLA relayout upstream,
    # in exchange for full-lane kernel work and a relayout-free (1, TB) output).
    st = state.astype(compute_dtype).T                            # (ds, B)
    at = action.astype(compute_dtype).T                           # (da, B)

    if B <= block_b:
        tb, grid_b = B, 1                  # single block == full dims (no alignment issue)
    else:
        chunks = pl.cdiv(B, 128)           # number of 128-wide lane chunks
        grid_b = pl.cdiv(B, block_b)
        grid_b = max(2, 2 * (grid_b // 2))  # even tile count -> balanced on v7x's 2 TCs
        tb = 128 * pl.cdiv(chunks, grid_b)  # lane-aligned (multiple of 128), kept large
        grid_b = pl.cdiv(B, tb)            # ragged tail handled by Pallas (no jnp.pad)

    def _resident(shape):
        return pl.BlockSpec(shape, lambda i: (0, 0))   # weights resident across the grid

    q = pl.pallas_call(
        _critic_kernel,
        out_shape=jax.ShapeDtypeStruct((1, B), jnp.float32),
        grid=(grid_b,),
        in_specs=[
            pl.BlockSpec((ds, tb), lambda i: (0, i)),
            pl.BlockSpec((da, tb), lambda i: (0, i)),
            _resident((ds, ds)),
            _resident((ds, da)),
            _resident((da, da)),
        ],
        out_specs=pl.BlockSpec((1, tb), lambda i: (0, i)),
        compiler_params=pltpu.CompilerParams(
            dimension_semantics=("parallel",),   # independent batch tiles
        ),
    )(st, at, wss, wx, waa)

    return q[0].reshape(B, 1)


def critic_reference(state, action, weight):
    """Pure-JAX reference mirroring the PyTorch forward exactly."""
    sa = jnp.concatenate([state, action], axis=1)
    X = jnp.einsum("bi,bj->bij", sa, sa).reshape(state.shape[0], -1)
    return X @ weight.reshape(1, -1).T   # Linear(bias=False): x @ W^T


if __name__ == "__main__":
    key = jax.random.PRNGKey(0)
    k1, k2, k3, k4, k5 = jax.random.split(key, 5)

    # Small shapes implied by the module: Critic(ds=10, da=6), batch=8.
    B, ds, da = 8, 10, 6
    n = ds + da

    state = jax.random.normal(k1, (B, ds), dtype=jnp.float32)
    action = jax.random.normal(k2, (B, da), dtype=jnp.float32)
    bound = 1.0 / (n * n) ** 0.5
    weight = jax.random.uniform(k3, (1, n * n), dtype=jnp.float32,
                                minval=-bound, maxval=bound)

    q = jax.block_until_ready(critic_forward(state, action, weight))
    q_ref = critic_reference(state, action, weight)
    assert q.shape == (B, 1)
    assert jnp.allclose(q, q_ref, atol=1e-4, rtol=1e-4), (q, q_ref)

    # Secondary check: exercises the multi-tile grid with a ragged tail (no jnp.pad).
    B2 = 2500
    state2 = jax.random.normal(k4, (B2, ds), dtype=jnp.float32)
    action2 = jax.random.normal(k5, (B2, da), dtype=jnp.float32)
    q2 = jax.block_until_ready(critic_forward(state2, action2, weight))
    q2_ref = critic_reference(state2, action2, weight)
    assert q2.shape == (B2, 1)
    assert jnp.allclose(q2, q2_ref, atol=1e-4, rtol=1e-4)

    print("KERNEL_OK")
</pallas_src>

<mosaic_0001>
module attributes {stable_mosaic.version = 11 : i64} {
  func.func @_critic_kernel(%arg0: i32, %arg1: memref<10x8xf32, #tpu.memory_space<vmem>>, %arg2: memref<6x8xf32, #tpu.memory_space<vmem>>, %arg3: memref<10x10xf32, #tpu.memory_space<vmem>>, %arg4: memref<10x6xf32, #tpu.memory_space<vmem>>, %arg5: memref<6x6xf32, #tpu.memory_space<vmem>>, %arg6: memref<1x8xf32, #tpu.memory_space<vmem>>) attributes {dimension_semantics = [#tpu.dimension_semantics<parallel>], iteration_bounds = array<i64: 1>, scalar_prefetch = 0 : i64, scratch_operands = 0 : i64, tpu.core_type = #tpu.core_type<tc>, window_params = [{transform_indices = @transform_0, window_bounds = array<i64: 10, 8>}, {transform_indices = @transform_1, window_bounds = array<i64: 6, 8>}, {pipeline_mode = #tpu.pipeline_mode<synchronous>, transform_indices = @transform_2, window_bounds = array<i64: 10, 10>}, {pipeline_mode = #tpu.pipeline_mode<synchronous>, transform_indices = @transform_3, window_bounds = array<i64: 10, 6>}, {pipeline_mode = #tpu.pipeline_mode<synchronous>, transform_indices = @transform_4, window_bounds = array<i64: 6, 6>}, {transform_indices = @transform_5, window_bounds = array<i64: 1, 8>}]} {
    %c0 = arith.constant 0 : index
    %c0_0 = arith.constant 0 : index
    %0 = vector.load %arg1[%c0, %c0_0] : memref<10x8xf32, #tpu.memory_space<vmem>>, vector<10x8xf32>
    %c0_1 = arith.constant 0 : index
    %c0_2 = arith.constant 0 : index
    %1 = vector.load %arg2[%c0_1, %c0_2] : memref<6x8xf32, #tpu.memory_space<vmem>>, vector<6x8xf32>
    %c0_3 = arith.constant 0 : index
    %c0_4 = arith.constant 0 : index
    %2 = vector.load %arg3[%c0_3, %c0_4] : memref<10x10xf32, #tpu.memory_space<vmem>>, vector<10x10xf32>
    %cst = arith.constant dense<0.000000e+00> : vector<10x8xf32>
    %3 = tpu.matmul %2, %0, %cst {dimension_numbers = #tpu.dot_dimension_numbers<[1], [0], [0], [1], [0, 0, 1, 1], [], []>} : vector<10x10xf32>, vector<10x8xf32>, vector<10x8xf32> -> vector<10x8xf32>
    %c0_5 = arith.constant 0 : index
    %c0_6 = arith.constant 0 : index
    %4 = vector.load %arg4[%c0_5, %c0_6] : memref<10x6xf32, #tpu.memory_space<vmem>>, vector<10x6xf32>
    %cst_7 = arith.constant dense<0.000000e+00> : vector<10x8xf32>
    %5 = tpu.matmul %4, %1, %cst_7 {dimension_numbers = #tpu.dot_dimension_numbers<[1], [0], [0], [1], [0, 0, 1, 1], [], []>} : vector<10x6xf32>, vector<6x8xf32>, vector<10x8xf32> -> vector<10x8xf32>
    %6 = arith.addf %3, %5 : vector<10x8xf32>
    %c0_8 = arith.constant 0 : index
    %c0_9 = arith.constant 0 : index
    %7 = vector.load %arg5[%c0_8, %c0_9] : memref<6x6xf32, #tpu.memory_space<vmem>>, vector<6x6xf32>
    %cst_10 = arith.constant dense<0.000000e+00> : vector<6x8xf32>
    %8 = tpu.matmul %7, %1, %cst_10 {dimension_numbers = #tpu.dot_dimension_numbers<[1], [0], [0], [1], [0, 0, 1, 1], [], []>} : vector<6x6xf32>, vector<6x8xf32>, vector<6x8xf32> -> vector<6x8xf32>
    %9 = arith.mulf %0, %6 : vector<10x8xf32>
    %cst_11 = arith.constant dense<0.000000e+00> : vector<8xf32>
    %10 = vector.multi_reduction <add>, %9, %cst_11 [0] : vector<10x8xf32> to vector<8xf32>
    %11 = vector.shape_cast %10 : vector<8xf32> to vector<1x8xf32>
    %12 = arith.mulf %1, %8 : vector<6x8xf32>
    %cst_12 = arith.constant dense<0.000000e+00> : vector<8xf32>
    %13 = vector.multi_reduction <add>, %12, %cst_12 [0] : vector<6x8xf32> to vector<8xf32>
    %14 = vector.shape_cast %13 : vector<8xf32> to vector<1x8xf32>
    %15 = arith.addf %11, %14 : vector<1x8xf32>
    %c0_13 = arith.constant 0 : index
    %c0_14 = arith.constant 0 : index
    %16 = vector.load %arg6[%c0_13, %c0_14] : memref<1x8xf32, #tpu.memory_space<vmem>>, vector<1x8xf32>
    tpu.vector_store %arg6[%c0_13, %c0_14], %15 {strides = array<i32>} : memref<1x8xf32, #tpu.memory_space<vmem>>, vector<1x8xf32>,
    return
  }
  func.func @transform_0(%arg0: i32) -> (i32, i32) {
    %c0_i32 = arith.constant 0 : i32
    %c0_i32_0 = arith.constant 0 : i32
    return %c0_i32, %arg0 : i32, i32
  }
  func.func @transform_1(%arg0: i32) -> (i32, i32) {
    %c0_i32 = arith.constant 0 : i32
    %c0_i32_0 = arith.constant 0 : i32
    return %c0_i32, %arg0 : i32, i32
  }
  func.func @transform_2(%arg0: i32) -> (i32, i32) {
    %c0_i32 = arith.constant 0 : i32
    %c0_i32_0 = arith.constant 0 : i32
    %c0_i32_1 = arith.constant 0 : i32
    return %c0_i32, %c0_i32_0 : i32, i32
  }
  func.func @transform_3(%arg0: i32) -> (i32, i32) {
    %c0_i32 = arith.constant 0 : i32
    %c0_i32_0 = arith.constant 0 : i32
    %c0_i32_1 = arith.constant 0 : i32
    return %c0_i32, %c0_i32_0 : i32, i32
  }
  func.func @transform_4(%arg0: i32) -> (i32, i32) {
    %c0_i32 = arith.constant 0 : i32
    %c0_i32_0 = arith.constant 0 : i32
    %c0_i32_1 = arith.constant 0 : i32
    return %c0_i32, %c0_i32_0 : i32, i32
  }
  func.func @transform_5(%arg0: i32) -> (i32, i32) {
    %c0_i32 = arith.constant 0 : i32
    %c0_i32_0 = arith.constant 0 : i32
    return %c0_i32, %arg0 : i32, i32
  }
}

</mosaic_0001>

<bundles_post_ra>
// kernel: tpu_custom_call.1
= control target key start
LH: loop header
LB: loop body
LE: loop exit
PB: predicated region body
PF: predicated region fallthrough
CT: control target
= control target key end

     0   :  { %vm35_vm0 = vcmask 1045504   ;;  %vm28_vm1 = vcmask 48128   ;;  %vm121_vm2 = vcmask 1041408   ;;  %vm383_vm3 = vmmov 1   ;;  %s459_s0 = inlined_call_operand.vmem [shape: f32[10,8], index: 0, kind: input, shape index: {}]   ;;  %s460_s1 = inlined_call_operand.vmem [shape: f32[6,8], index: 1, kind: input, shape index: {}]   ;;  %s461_s2 = inlined_call_operand.vmem [shape: f32[10,10], index: 2, kind: input, shape index: {}]   ;;  %s462_s3 = inlined_call_operand.vmem [shape: f32[10,6], index: 3, kind: input, shape index: {}]   ;;  %s463_s4 = inlined_call_operand.vmem [shape: f32[6,6], index: 4, kind: input, shape index: {}]   ;;  %s464_s5 = inlined_call_operand.hbm [shape: f32[1,8], index: 5, kind: output, shape index: {}]  }
   0x1   :  { %v23_v0 = vld [vmem:[%s460_s1] sm:$0x3f]  ;;  %v27_v3 = vld [vmem:[%s462_s3 + $0x8] sm:$0x3]  ;;  %vm348_vm4 = vmpackc.low %vm121_vm2, %vm383_vm3  ;;  %v384_v6 = vmov 0.0   ;;  %vm114_vm5 = vcmask 80896  }
   0x2   :  { %v26_v1 = vld [vmem:[%s462_s3] sm:$0xff]  ;;  %330 = vmatprep.subr.msk.mxu0 %vm35_vm0, %v23_v0  ;;  %v22_v4 = vld [vmem:[%s459_s0 + $0x8] sm:$0x3]  ;;  %342 = vmatprep.subr.mxu1 %v384_v6 }
   0x3   :  { %v21_v2 = vld [vmem:[%s459_s0] sm:$0xff]  ;;  %332 = vmatprep.mubr.msk.f32.mxu0 %vm28_vm1, %v26_v1  ;;  %331 = vmatpush3.msk.msra.mxu0 %vm35_vm0, %v23_v0 }
   0x4   :  { %v347_v5 = vpack.c.bf16 %v22_v4, %v21_v2  ;;  %333 = vmatmul.mubr.msk.f32.vlgmr.msra.gmra.mrb[0].mxu0 %vm28_vm1, %v27_v3  ;;  %v200_v7 = vld [vmem:[%s463_s4] sm:$0x3f] }
   0x5   :  { %v24_v8 = vld [vmem:[%s461_s2] sm:$0xff] }
   0x6   :  { %10 = vsyncpa [#allocation3], 0  ;;  %349 = vmatprep.subr.msk.bf16.mxu0 %vm348_vm4, %v347_v5  ;;  %343 = vmatpush3.msk.msra.mxu1 %vm35_vm0, %v23_v0  ;;  %vm385_vm6 = vmmov 0   ;;  %v25_v9 = vld [vmem:[%s461_s2 + $0x8] sm:$0x3]  ;;  %vm288_vm7 = vcmask 62464  }
   0x7   :  { %352 = vmatpush3.bf16.msk.msra.mxu0 %vm348_vm4, %v347_v5  ;;  %344 = vmatprep.mubr.msk.f32.mxu1 %vm385_vm6, %v384_v6  ;;  %vm278_vm8 = vcmask 58368   ;;  %vm276_vm9 = vcmask 64512   ;;  %s386_s2 = smov [#allocation2]   ;;  %vm297_vm10 = vcmask 57344  }
   0x8   :  { %345 = vmatmul.mubr.msk.f32.vlgmr.msra.gmra.mrb[0].mxu1 %vm28_vm1, %v200_v7  ;;  %339 = vmatprep.mubr.msk.f32.mxu0 %vm114_vm5, %v24_v8  ;;  %s305_s4 = sshll.u32 %s386_s2, 4  ;;  %s306_s4 = int_to_ptr.vmem [resolvable:$true] %s305_s4 }
   0x9   :  { %s359_s6 = scalar_lea.vmem %s306_s4, 16  ;;  %s363_s7 = scalar_lea.vmem %s306_s4, 32 }
   0xa   :  { %p360_p0 = scmp.ne.s32.totalorder %s306_s4, %s359_s6  ;;  %p364_p1 = scmp.lt.s32.totalorder %s306_s4, %s306_s4 }
   0xb   :  { %p365_p2 = scmp.lt.s32.totalorder %s363_s7, %s359_s6 }
   0xc   :  { %340 = vmatmul.mubr.msk.f32.vlgmr.msra.gmra.mrb[0].mxu0 %vm114_vm5, %v25_v9 }
   0xd   :  { %p366_p3 = por %p365_p2, %p364_p1 }
   0xf   :  { %p367_p4 = pnand %p366_p3, %p360_p0 }
  0xdb   :  { %v270_v10 = vpop.f32.mrb[0].mxu1 }
  0xdc   :  { %v287_v11 = vmul.f32 %v270_v10, %v23_v0  ;;  %v346_v12 = vpop.f32.mrb[1].mxu1 }
  0xde   :  { %v289_v13 = vsel %vm288_vm7, %v287_v11, 0.0 }
  0xdf   :  { %v290_v14 = vrot.slane %v289_v13, 4  ;;  %v341_v15 = vpop.f32.mrb[0].mxu0 }
  0xe0   :  { %v275_v17 = vmul.f32 %v341_v15, %v22_v4  ;;  %v191_v18 = vpop.f32.mrb[1].mxu0 }
  0xe1   :  { %v291_v16 = vadd.f32 %v290_v14, %v289_v13  ;;  %v274_v19 = vmul.f32 %v191_v18, %v21_v2 }
  0xe2   :  { %v279_v20 = vsel %vm278_vm8, %v275_v17, 0.0 }
  0xe3   :  { %v277_v21 = vsel %vm276_vm9, %v274_v19, 0.0  ;;  %v292_v22 = vrot.slane %v291_v16, 2 }
  0xe4   :  { %v280_v23 = vadd.f32 %v279_v20, %v277_v21 }
  0xe5   :  { %v293_v25 = vadd.f32 %v292_v22, %v291_v16 }
  0xe6   :  { %v281_v24 = vrot.slane %v280_v23, 4 }
  0xe7   :  { %v294_v28 = vrot.slane %v293_v25, 1 }
  0xe8   :  { %v282_v26 = vadd.f32 %v281_v24, %v280_v23 }
  0xe9   :  { %v295_v32 = vadd.f32 %v294_v28, %v293_v25 }
  0xea   :  { %v283_v27 = vrot.slane %v282_v26, 2 }
  0xec   :  { %v284_v29 = vadd.f32 %v283_v27, %v282_v26 }
  0xee   :  { %v285_v30 = vrot.slane %v284_v29, 1 }
  0xf0   :  { %v286_v31 = vadd.f32 %v285_v30, %v284_v29 }
  0xf2   :  { %v296_v33 = vadd.f32 %v295_v32, %v286_v31 }
  0xf4   :  { %298 = vst.msk [vmem:[#allocation2] sm:$0x1] %vm297_vm10, %v296_v33 }
  0xf5   :  { %370 = shalt.err (!%p367_p4)
}
  0xf6   :  { %s371_s10 = scalar_lea.hbm %s464_s5, 16 }
  0xf7   :  { %p372_p5 = scmp.ne.s32.totalorder %s464_s5, %s371_s10  ;;  %p375_p6 = scmp.lt.u32.totalorder %s371_s10, %s464_s5 }
  0xf9   :  { %p377_p7 = pnand %p375_p6, %p372_p5 }
  0xfb   :  { %380 = shalt.err (!%p377_p7)
}
  0xfc   :  { %308 = dma.vmem_to_hbm [thread:$0]  %s306_s4, 16, %s464_s5, [#allocation3]  }
  0xfd   :  { %381 = dma.done.wait [#allocation3], 16  }
  0xfe   :  { %382 = vsyncadd [#allocation3], 4294967280 }
  0xff   :  { %312 = vsyncpa [#allocation3], 1 }

</bundles_post_ra>
